<compile_context>
chip_gen: v7x
topology: tpu7x:2x2x1
jax: 0.10.0
libtpu: 0.0.40
codegen_flags: <defaults>
</compile_context>

<pallas_src>
import numpy as np
import jax
import jax.numpy as jnp
from jax.experimental import pallas as pl
from jax.experimental.pallas import tpu as pltpu

# ---- architecture constants implied by the module ----------------------------
K_SORT = 30            # SortAggregation k
C1 = 64                # GCNConv1 out channels
CAT = C1 + 1           # cat([x_1, x_2]) -> 65 channels
GCN_OUT = 128          # lane-dense padded GCN output width (zeros in 65..127)
L = K_SORT * CAT       # 1950
KW3, OC3 = 97, 16      # Conv1d(1, 16, 97, 97)
T3 = (L - KW3) // KW3 + 1   # 20
TP = T3 // 2                # 10 after MaxPool1d(2, 2)
KW4, OC4 = 5, 32            # Conv1d(16, 32, 5, 1)
T4 = TP - KW4 + 1           # 6
FLAT = OC4 * T4             # 192
HID = 128                   # classifier_1 out


def _full_spec(shape):
    return pl.BlockSpec(shape, lambda i, _s=shape: (0,) * len(_s))


_ARB = pltpu.CompilerParams(dimension_semantics=("arbitrary",))


# ------------------------------ GCN kernel -----------------------------------
def gcn_kernel(a_ref, dinv_ref, x_ref, w1_ref, b1_ref, w2r_ref, b2_ref, h_ref):
    a = a_ref[...]                                    # (N, N) bf16 (exact ints)
    dinv = dinv_ref[...]                              # (N, 1) f32
    # layer 1: tanh(a_hat @ (x @ W1) + b1), with a_hat = dinv * A_tilde * dinv
    # folded in as row scalings around the bf16 MXU matmul.
    xw = jnp.dot(x_ref[...].astype(jnp.bfloat16),
                 w1_ref[...].astype(jnp.bfloat16),
                 preferred_element_type=jnp.float32)              # (N, 64) f32
    axw = jnp.dot(a, (dinv * xw).astype(jnp.bfloat16),
                  preferred_element_type=jnp.float32)             # (N, 64) f32
    h1 = jnp.tanh(dinv * axw + b1_ref[...])                       # (N, 64) f32
    # layer 2: tanh(a_hat @ (h1 @ W2) + b2) == tanh((a_hat @ h1) @ W2 + b2).
    # Keep the MXU fed with the 64-wide matmul; the width-1 contraction with
    # the W2 row is a VPU broadcast-multiply + lane reduce.
    ah1 = jnp.dot(a, (dinv * h1).astype(jnp.bfloat16),
                  preferred_element_type=jnp.float32)             # (N, 64) f32
    ah1 = dinv * ah1
    h2 = jnp.tanh(jnp.sum(ah1 * w2r_ref[...], axis=-1, keepdims=True)
                  + b2_ref[...])                                  # (N, 1)
    # single lane-dense (N, 128) slab, one unmasked store
    zpad = jnp.zeros((h1.shape[0], GCN_OUT - CAT), jnp.float32)
    h_ref[...] = jnp.concatenate([h1, h2, zpad], axis=-1)


def gcn_forward(a_tilde_bf16, dinv, x, w1, b1, w2r, b2):
    N, F = x.shape
    return pl.pallas_call(
        gcn_kernel,
        out_shape=jax.ShapeDtypeStruct((N, GCN_OUT), jnp.float32),
        grid=(1,),
        in_specs=[_full_spec((N, N)), _full_spec((N, 1)), _full_spec((N, F)),
                  _full_spec((F, C1)), _full_spec((1, C1)),
                  _full_spec((1, C1)), _full_spec((1, 1))],
        out_specs=_full_spec((N, GCN_OUT)),
        compiler_params=_ARB,
    )(a_tilde_bf16, dinv, x, w1, b1, w2r, b2)


# ------------------------------ Head kernel ----------------------------------
# Row layout for xin: row r = tp * B + b (time-major, batch fastest), B is a
# multiple of 8 so every shifted row slice below is sublane-aligned.
#   lanes [0:97)    = x_agg chunk (2*tp)   of graph b
#   lanes [97:194)  = x_agg chunk (2*tp+1) of graph b
def head_kernel(xin_ref, w3d_ref, b3d_ref, w4f_ref, b4_ref,
                w5f_ref, b5_ref, w6_ref, b6_ref,
                classes_ref, out_ref, last_ref):
    B = last_ref.shape[0]

    # Conv1d(1,16,97,97) on both chunks of the pool-pair at once (block-diag
    # weight), ReLU, then MaxPool1d(2,2) = lane-wise max of the two halves.
    y3 = jnp.maximum(
        jnp.dot(xin_ref[...], w3d_ref[...], preferred_element_type=jnp.float32)
        + b3d_ref[...], 0.0)                              # (TP*B, 32)
    pooled = jnp.maximum(y3[:, :OC3], y3[:, OC3:])        # (TP*B, 16)

    # Conv1d(16,32,5,1): sum of KW4 shifted small matmuls (no lane concat,
    # no sublane relayout). w4f rows are already blocked as k*OC3:(k+1)*OC3.
    w4 = w4f_ref[...]
    acc4 = jnp.zeros((T4 * B, OC4), jnp.float32)
    for k in range(KW4):
        acc4 = acc4 + jnp.dot(pooled[k * B:k * B + T4 * B, :],
                              w4[k * OC3:(k + 1) * OC3, :],
                              preferred_element_type=jnp.float32)
    h4 = jnp.maximum(acc4 + b4_ref[...], 0.0)             # (T4*B, 32), row = t*B+b

    # classifier_1: sum of T4 shifted matmuls. w5f rows blocked as t*OC4.
    w5 = w5f_ref[...]
    acc5 = jnp.zeros((B, HID), jnp.float32)
    for t in range(T4):
        acc5 = acc5 + jnp.dot(h4[t * B:(t + 1) * B, :],
                              w5[t * OC4:(t + 1) * OC4, :],
                              preferred_element_type=jnp.float32)
    last = jnp.maximum(acc5 + b5_ref[...], 0.0)           # (B, 128)

    # classifier_2 + log_softmax
    logits = jnp.dot(last, w6_ref[...],
                     preferred_element_type=jnp.float32) + b6_ref[...]
    m = jnp.max(logits, axis=-1, keepdims=True)
    z = logits - m
    lsm = z - jnp.log(jnp.sum(jnp.exp(z), axis=-1, keepdims=True))

    # whole-block stores
    classes_ref[...] = lsm
    out_ref[...] = logits
    last_ref[...] = last


def head_forward(xin, w3d, b3d, w4f, b4, w5f, b5, w6, b6, B, num_classes):
    # TODO(synk): when B grows, add a row-parallel grid axis over batch chunks
    # (marked "parallel") so v7x's two TensorCores both do work.
    return pl.pallas_call(
        head_kernel,
        out_shape=(jax.ShapeDtypeStruct((B, num_classes), jnp.float32),
                   jax.ShapeDtypeStruct((B, num_classes), jnp.float32),
                   jax.ShapeDtypeStruct((B, HID), jnp.float32)),
        grid=(1,),
        in_specs=[_full_spec((TP * B, 2 * KW3)),
                  _full_spec((2 * KW3, 2 * OC3)), _full_spec((1, 2 * OC3)),
                  _full_spec((KW4 * OC3, OC4)), _full_spec((1, OC4)),
                  _full_spec((FLAT, HID)), _full_spec((1, HID)),
                  _full_spec((HID, num_classes)), _full_spec((1, num_classes))],
        out_specs=(_full_spec((B, num_classes)),
                   _full_spec((B, num_classes)),
                   _full_spec((B, HID))),
        compiler_params=_ARB,
    )(xin, w3d, b3d, w4f, b4, w5f, b5, w6, b6)


# --------------------------- full forward (glue + kernels) -------------------
def dgcnn0_forward(x, edge_index, batch, params, num_graphs, num_classes):
    N = x.shape[0]
    src, dst = edge_index[0], edge_index[1]

    # remove_self_loops + GCN re-adds self loops; symmetric normalization is
    # folded into the kernel via dinv (no a_hat materialization).
    not_self = (src != dst).astype(jnp.float32)
    A = jnp.zeros((N, N), jnp.float32).at[dst, src].add(not_self)
    A_tilde = A + jnp.eye(N, dtype=jnp.float32)
    deg = jnp.sum(A_tilde, axis=1)
    dinv = jax.lax.rsqrt(deg)[:, None]                       # (N, 1) f32
    # A_tilde holds small integer counts -> bf16 cast is exact.
    a_bf16 = A_tilde.astype(jnp.bfloat16)

    # Both GCN layers fused in one Pallas kernel (dropout = identity in eval).
    h = gcn_forward(a_bf16, dinv, x, params["w1"], params["b1"],
                    params["w2r"], params["b2"])             # (N, 128) lane-dense
    h = h[:, :CAT]                                           # (N, 65)

    # SortAggregation: one batched masked top_k + one gather (no per-graph
    # sort loop).  Padding rows (graphs with < k nodes) are zeroed.
    key_feat = h[:, CAT - 1]
    in_g = batch[None, :] == jnp.arange(num_graphs, dtype=batch.dtype)[:, None]
    keys = jnp.where(in_g, key_feat[None, :], -jnp.inf)      # (G, N)
    topv, topi = jax.lax.top_k(keys, K_SORT)                 # (G, 30)
    valid = (topv != -jnp.inf).astype(h.dtype)
    x_agg = (h[topi] * valid[..., None]).reshape(num_graphs, L)   # (G, 1950)

    # Pad batch to a multiple of 8 so every k*B / t*B row slice in the head
    # kernel is sublane-aligned; padded rows are zeros and sliced off below.
    B_pad = max(8, -(-num_graphs // 8) * 8)
    x_agg_p = jnp.zeros((B_pad, L), x_agg.dtype).at[:num_graphs].set(x_agg)

    # im2col for Conv1d(1,16,97,97): disjoint chunks, pool-pairs packed along
    # lanes, rows ordered time-major (row = tp*B_pad + b).
    x3 = x_agg_p[:, :T3 * KW3].reshape(B_pad, T3, KW3)       # (B_pad, 20, 97)
    xin = jnp.concatenate([x3[:, 0::2], x3[:, 1::2]], axis=-1)    # (B_pad, TP, 194)
    xin = jnp.transpose(xin, (1, 0, 2)).reshape(TP * B_pad, 2 * KW3)

    classes, out, last_layer = head_forward(
        xin, params["w3d"], params["b3d"], params["w4f"], params["b4"],
        params["w5f"], params["b5"], params["w6"], params["b6"],
        B_pad, num_classes)
    return (classes[:num_graphs], out[:num_graphs], last_layer[:num_graphs])


# ------------------------------ parameters -----------------------------------
def init_params(key, num_features, num_classes):
    """Builds kernel-ready parameters (all torch-layout folding done here)."""
    ks = jax.random.split(key, 12)
    s = 0.1
    # GCNConv1: (in, out) + bias
    w1 = jax.random.normal(ks[0], (num_features, C1), jnp.float32) * s
    b1 = jax.random.normal(ks[1], (1, C1), jnp.float32) * s
    # GCNConv2: torch weight (64, 1) -> row (1, 64) for the VPU lane-reduce
    w2 = jax.random.normal(ks[2], (C1, 1), jnp.float32) * s
    w2r = jnp.transpose(w2, (1, 0))                        # (1, 64)
    b2 = jax.random.normal(ks[3], (1, 1), jnp.float32) * s
    # Conv1d(1,16,97,97): torch (16,1,97) -> (97,16), block-diag doubled so the
    # even/odd pool-pair is one matmul.
    wc3 = jax.random.normal(ks[4], (OC3, 1, KW3), jnp.float32) * s
    w3 = jnp.transpose(wc3.reshape(OC3, KW3), (1, 0))      # (97, 16)
    w3d = jnp.zeros((2 * KW3, 2 * OC3), jnp.float32)
    w3d = w3d.at[:KW3, :OC3].set(w3).at[KW3:, OC3:].set(w3)
    b3 = jax.random.normal(ks[5], (1, OC3), jnp.float32) * s
    b3d = jnp.concatenate([b3, b3], axis=-1)               # (1, 32)
    # Conv1d(16,32,5,1): torch (32,16,5) -> (5,16,32) -> block rows (80,32),
    # row = k*OC3 + ic  (matches the shifted-matmul accumulation in-kernel).
    wc4 = jax.random.normal(ks[6], (OC4, OC3, KW4), jnp.float32) * s
    w4f = jnp.transpose(wc4, (2, 1, 0)).reshape(KW4 * OC3, OC4)
    b4 = jax.random.normal(ks[7], (1, OC4), jnp.float32) * s
    # Linear(192,128): torch (128,192); fold channel-major flatten
    # (flat j = oc*T4 + t) into a (t, oc)-ordered (192, 128) weight,
    # row = t*OC4 + oc (matches the shifted-matmul accumulation in-kernel).
    wl1 = jax.random.normal(ks[8], (HID, FLAT), jnp.float32) * s
    w5f = jnp.transpose(wl1.reshape(HID, OC4, T4), (2, 1, 0)).reshape(FLAT, HID)
    b5 = jax.random.normal(ks[9], (1, HID), jnp.float32) * s
    # Linear(128,C): torch (C,128) -> (128,C)
    wl2 = jax.random.normal(ks[10], (num_classes, HID), jnp.float32) * s
    w6 = jnp.transpose(wl2, (1, 0))
    b6 = jax.random.normal(ks[11], (1, num_classes), jnp.float32) * s
    return dict(w1=w1, b1=b1, w2r=w2r, b2=b2, w3d=w3d, b3d=b3d,
                w4f=w4f, b4=b4, w5f=w5f, b5=b5, w6=w6, b6=b6)


if __name__ == "__main__":
    num_features, num_classes = 8, 4
    nodes_per_graph, num_graphs = 20, 2
    N = nodes_per_graph * num_graphs

    key = jax.random.PRNGKey(0)
    kx, kp = jax.random.split(key)

    x = jax.random.normal(kx, (N, num_features), jnp.float32)
    batch = jnp.array([g for g in range(num_graphs)
                       for _ in range(nodes_per_graph)], jnp.int32)

    # deterministic graph: per-graph ring + a chord + self loops (to be removed)
    edges = []
    for g in range(num_graphs):
        off = g * nodes_per_graph
        for i in range(nodes_per_graph):
            j = (i + 1) % nodes_per_graph
            edges.append((off + i, off + j))
            edges.append((off + j, off + i))
            edges.append((off + i, off + i))          # self loop
        edges.append((off + 0, off + 10))
        edges.append((off + 10, off + 0))
    edge_index = jnp.asarray(np.array(edges, dtype=np.int32).T)   # (2, E)

    params = init_params(kp, num_features, num_classes)

    classes, out, last_layer = dgcnn0_forward(
        x, edge_index, batch, params, num_graphs, num_classes)
    jax.block_until_ready((classes, out, last_layer))

    assert classes.shape == (num_graphs, num_classes)
    assert out.shape == (num_graphs, num_classes)
    assert last_layer.shape == (num_graphs, HID)
    # log_softmax sanity: rows sum to 1 in prob space
    assert bool(jnp.allclose(jnp.sum(jnp.exp(classes), axis=-1), 1.0, atol=1e-3))
    assert bool(jnp.all(jnp.isfinite(out))) and bool(jnp.all(jnp.isfinite(last_layer)))
    print("KERNEL_OK")
</pallas_src>

<mosaic_0001>
module attributes {stable_mosaic.version = 11 : i64} {
  func.func @gcn_kernel(%arg0: i32, %arg1: memref<40x40xbf16, #tpu.memory_space<vmem>>, %arg2: memref<40x1xf32, #tpu.memory_space<vmem>>, %arg3: memref<40x8xf32, #tpu.memory_space<vmem>>, %arg4: memref<8x64xf32, #tpu.memory_space<vmem>>, %arg5: memref<1x64xf32, #tpu.memory_space<vmem>>, %arg6: memref<1x64xf32, #tpu.memory_space<vmem>>, %arg7: memref<1x1xf32, #tpu.memory_space<vmem>>, %arg8: memref<40x128xf32, #tpu.memory_space<vmem>>) attributes {dimension_semantics = [#tpu.dimension_semantics<arbitrary>], iteration_bounds = array<i64: 1>, scalar_prefetch = 0 : i64, scratch_operands = 0 : i64, tpu.core_type = #tpu.core_type<tc>, window_params = [{pipeline_mode = #tpu.pipeline_mode<synchronous>, transform_indices = @transform_0, window_bounds = array<i64: 40, 40>}, {pipeline_mode = #tpu.pipeline_mode<synchronous>, transform_indices = @transform_1, window_bounds = array<i64: 40, 1>}, {pipeline_mode = #tpu.pipeline_mode<synchronous>, transform_indices = @transform_2, window_bounds = array<i64: 40, 8>}, {pipeline_mode = #tpu.pipeline_mode<synchronous>, transform_indices = @transform_3, window_bounds = array<i64: 8, 64>}, {pipeline_mode = #tpu.pipeline_mode<synchronous>, transform_indices = @transform_4, window_bounds = array<i64: 1, 64>}, {pipeline_mode = #tpu.pipeline_mode<synchronous>, transform_indices = @transform_5, window_bounds = array<i64: 1, 64>}, {pipeline_mode = #tpu.pipeline_mode<synchronous>, transform_indices = @transform_6, window_bounds = array<i64: 1, 1>}, {pipeline_mode = #tpu.pipeline_mode<synchronous>, transform_indices = @transform_7, window_bounds = array<i64: 40, 128>}]} {
    %c0 = arith.constant 0 : index
    %c0_0 = arith.constant 0 : index
    %0 = vector.load %arg1[%c0, %c0_0] : memref<40x40xbf16, #tpu.memory_space<vmem>>, vector<40x40xbf16>
    %c0_1 = arith.constant 0 : index
    %c0_2 = arith.constant 0 : index
    %1 = vector.load %arg2[%c0_1, %c0_2] : memref<40x1xf32, #tpu.memory_space<vmem>>, vector<40x1xf32>
    %c0_3 = arith.constant 0 : index
    %c0_4 = arith.constant 0 : index
    %2 = vector.load %arg3[%c0_3, %c0_4] : memref<40x8xf32, #tpu.memory_space<vmem>>, vector<40x8xf32>
    %3 = arith.truncf %2 : vector<40x8xf32> to vector<40x8xbf16>
    %c0_5 = arith.constant 0 : index
    %c0_6 = arith.constant 0 : index
    %4 = vector.load %arg4[%c0_5, %c0_6] : memref<8x64xf32, #tpu.memory_space<vmem>>, vector<8x64xf32>
    %5 = arith.truncf %4 : vector<8x64xf32> to vector<8x64xbf16>
    %cst = arith.constant dense<0.000000e+00> : vector<40x64xf32>
    %6 = tpu.matmul %3, %5, %cst {dimension_numbers = #tpu.dot_dimension_numbers<[1], [0], [0], [1], [0, 0, 1, 1], [], []>} : vector<40x8xbf16>, vector<8x64xbf16>, vector<40x64xf32> -> vector<40x64xf32>
    %7 = vector.broadcast %1 : vector<40x1xf32> to vector<40x64xf32>
    %8 = arith.mulf %7, %6 : vector<40x64xf32>
    %9 = arith.truncf %8 : vector<40x64xf32> to vector<40x64xbf16>
    %cst_7 = arith.constant dense<0.000000e+00> : vector<40x64xf32>
    %10 = tpu.matmul %0, %9, %cst_7 {dimension_numbers = #tpu.dot_dimension_numbers<[1], [0], [0], [1], [0, 0, 1, 1], [], []>} : vector<40x40xbf16>, vector<40x64xbf16>, vector<40x64xf32> -> vector<40x64xf32>
    %11 = vector.broadcast %1 : vector<40x1xf32> to vector<40x64xf32>
    %12 = arith.mulf %11, %10 : vector<40x64xf32>
    %c0_8 = arith.constant 0 : index
    %c0_9 = arith.constant 0 : index
    %13 = vector.load %arg5[%c0_8, %c0_9] : memref<1x64xf32, #tpu.memory_space<vmem>>, vector<1x64xf32>
    %14 = vector.broadcast %13 : vector<1x64xf32> to vector<40x64xf32>
    %15 = arith.addf %12, %14 : vector<40x64xf32>
    %16 = math.tanh %15 : vector<40x64xf32>
    %17 = vector.broadcast %1 : vector<40x1xf32> to vector<40x64xf32>
    %18 = arith.mulf %17, %16 : vector<40x64xf32>
    %19 = arith.truncf %18 : vector<40x64xf32> to vector<40x64xbf16>
    %cst_10 = arith.constant dense<0.000000e+00> : vector<40x64xf32>
    %20 = tpu.matmul %0, %19, %cst_10 {dimension_numbers = #tpu.dot_dimension_numbers<[1], [0], [0], [1], [0, 0, 1, 1], [], []>} : vector<40x40xbf16>, vector<40x64xbf16>, vector<40x64xf32> -> vector<40x64xf32>
    %21 = vector.broadcast %1 : vector<40x1xf32> to vector<40x64xf32>
    %22 = arith.mulf %21, %20 : vector<40x64xf32>
    %c0_11 = arith.constant 0 : index
    %c0_12 = arith.constant 0 : index
    %23 = vector.load %arg6[%c0_11, %c0_12] : memref<1x64xf32, #tpu.memory_space<vmem>>, vector<1x64xf32>
    %24 = vector.broadcast %23 : vector<1x64xf32> to vector<40x64xf32>
    %25 = arith.mulf %22, %24 : vector<40x64xf32>
    %cst_13 = arith.constant dense<0.000000e+00> : vector<40xf32>
    %26 = vector.multi_reduction <add>, %25, %cst_13 [1] : vector<40x64xf32> to vector<40xf32>
    %27 = vector.shape_cast %26 : vector<40xf32> to vector<40x1xf32>
    %c0_14 = arith.constant 0 : index
    %c0_15 = arith.constant 0 : index
    %28 = vector.load %arg7[%c0_14, %c0_15] : memref<1x1xf32, #tpu.memory_space<vmem>>, vector<1x1xf32>
    %29 = vector.broadcast %28 : vector<1x1xf32> to vector<40x1xf32>
    %30 = arith.addf %27, %29 : vector<40x1xf32>
    %31 = math.tanh %30 : vector<40x1xf32>
    %cst_16 = arith.constant 0.000000e+00 : f32
    %32 = vector.broadcast %cst_16 : f32 to vector<40x63xf32>
    %33 = tpu.concatenate %16, %31, %32 in 1 : vector<40x64xf32>, vector<40x1xf32>, vector<40x63xf32> -> vector<40x128xf32>
    %c0_17 = arith.constant 0 : index
    %c0_18 = arith.constant 0 : index
    %34 = vector.load %arg8[%c0_17, %c0_18] : memref<40x128xf32, #tpu.memory_space<vmem>>, vector<40x128xf32>
    tpu.vector_store %arg8[%c0_17, %c0_18], %33 {strides = array<i32>} : memref<40x128xf32, #tpu.memory_space<vmem>>, vector<40x128xf32>,
    return
  }
  func.func @transform_0(%arg0: i32) -> (i32, i32) {
    %c0_i32 = arith.constant 0 : i32
    %c0_i32_0 = arith.constant 0 : i32
    %c0_i32_1 = arith.constant 0 : i32
    return %c0_i32, %c0_i32_0 : i32, i32
  }
  func.func @transform_1(%arg0: i32) -> (i32, i32) {
    %c0_i32 = arith.constant 0 : i32
    %c0_i32_0 = arith.constant 0 : i32
    %c0_i32_1 = arith.constant 0 : i32
    return %c0_i32, %c0_i32_0 : i32, i32
  }
  func.func @transform_2(%arg0: i32) -> (i32, i32) {
    %c0_i32 = arith.constant 0 : i32
    %c0_i32_0 = arith.constant 0 : i32
    %c0_i32_1 = arith.constant 0 : i32
    return %c0_i32, %c0_i32_0 : i32, i32
  }
  func.func @transform_3(%arg0: i32) -> (i32, i32) {
    %c0_i32 = arith.constant 0 : i32
    %c0_i32_0 = arith.constant 0 : i32
    %c0_i32_1 = arith.constant 0 : i32
    return %c0_i32, %c0_i32_0 : i32, i32
  }
  func.func @transform_4(%arg0: i32) -> (i32, i32) {
    %c0_i32 = arith.constant 0 : i32
    %c0_i32_0 = arith.constant 0 : i32
    %c0_i32_1 = arith.constant 0 : i32
    return %c0_i32, %c0_i32_0 : i32, i32
  }
  func.func @transform_5(%arg0: i32) -> (i32, i32) {
    %c0_i32 = arith.constant 0 : i32
    %c0_i32_0 = arith.constant 0 : i32
    %c0_i32_1 = arith.constant 0 : i32
    return %c0_i32, %c0_i32_0 : i32, i32
  }
  func.func @transform_6(%arg0: i32) -> (i32, i32) {
    %c0_i32 = arith.constant 0 : i32
    %c0_i32_0 = arith.constant 0 : i32
    %c0_i32_1 = arith.constant 0 : i32
    return %c0_i32, %c0_i32_0 : i32, i32
  }
  func.func @transform_7(%arg0: i32) -> (i32, i32) {
    %c0_i32 = arith.constant 0 : i32
    %c0_i32_0 = arith.constant 0 : i32
    %c0_i32_1 = arith.constant 0 : i32
    return %c0_i32, %c0_i32_0 : i32, i32
  }
}

</mosaic_0001>

<bundles_post_ra>
// kernel: tpu_custom_call.1
= control target key start
LH: loop header
LB: loop body
LE: loop exit
PB: predicated region body
PF: predicated region fallthrough
CT: control target
= control target key end

     0   :  { %s778_s0 = inlined_call_operand.vmem [shape: bf16[40,40], index: 0, kind: input, shape index: {}]   ;;  %s779_s1 = inlined_call_operand.vmem [shape: f32[40,1], index: 1, kind: input, shape index: {}]   ;;  %s780_s2 = inlined_call_operand.vmem [shape: f32[40,8], index: 2, kind: input, shape index: {}]   ;;  %s781_s3 = inlined_call_operand.vmem [shape: f32[8,64], index: 3, kind: input, shape index: {}]   ;;  %s782_s4 = inlined_call_operand.vmem [shape: f32[1,64], index: 4, kind: input, shape index: {}]   ;;  %s783_s5 = inlined_call_operand.vmem [shape: f32[1,64], index: 5, kind: input, shape index: {}]   ;;  %s784_s6 = inlined_call_operand.<no memory space> [shape: f32[1,1], index: 6, kind: input, shape index: {}]   ;;  %s785_s7 = inlined_call_operand.hbm [shape: f32[40,128], index: 7, kind: output, shape index: {}]  }
   0x1   :  { %v12_v0 = vstv %s784_s6 }
   0x2   :  { %13 = vst [vmem:[#allocation2] sm:$0x1] %v12_v0 }
   0x3   :  { %v48_v1 = vld [vmem:[%s781_s3] sm:$0xff]  ;;  %vm60_vm0 = vcmask 1043456   ;;  %v41_v3 = vld [vmem:[%s780_s2 + $0x8] sm:$0xff]  ;;  %v565_v4 = vmov 0.0   ;;  %vm566_vm1 = vmmov 0   ;;  %v37_v8 = vld [vmem:[%s779_s1 + $0x10] sm:$0xff] }
   0x4   :  { %v40_v2 = vld [vmem:[%s780_s2] sm:$0xff]  ;;  %457 = vmatprep.subr.bf16.mxu0 %v565_v4  ;;  %v49_v5 = vpack.c.bf16 %v48_v1, %v48_v1  ;;  %507 = vmatprep.subr.bf16.mxu1 %v565_v4  ;;  %vm50_vm2 = vcmask 64512   ;;  %v567_v12 = vmov 0  }
   0x5   :  { %v44_v6 = vld [vmem:[%s780_s2 + $0x20] sm:$0xff]  ;;  %459 = vmatprep.mubr.msk.bf16.mxu0 %vm566_vm1, %v565_v4  ;;  %467 = vmatprep.mubr.msk.bf16.mxu1 %vm566_vm1, %v565_v4  ;;  %v45_v10 = vpack.c.bf16 %v41_v3, %v40_v2 }
   0x6   :  { %v35_v7 = vld [vmem:[%s779_s1] sm:$0xff]  ;;  %v62_v9 = vsel %vm60_vm0, %v49_v5, 0  ;;  %v47_v11 = vpack.c.bf16 %v44_v6, %v44_v6  ;;  %516 = vset.pattern.permute.xlu0 %v567_v12  ;;  %517 = vset.pattern.permute.xlu1 %v567_v12 }
   0x7   :  { %458 = vmatpush3.bf16.msra.mxu0 %v62_v9  ;;  %508 = vmatpush3.bf16.msra.mxu1 %v62_v9 }
   0x8   :  { %122 = vperm.xlu0 %516, %v35_v7   ;;  %132 = vperm.xlu1 %517, %v37_v8  }
   0x9   :  { %14 = vsyncpa [#allocation4], 0  ;;  %v36_v13 = vld [vmem:[%s779_s1 + $0x8] sm:$0xff]  ;;  %v38_v14 = vld [vmem:[%s779_s1 + $0x18] sm:$0xff]  ;;  %471 = vmatprep.subr.bf16.mxu1 %v565_v4  ;;  %489 = vmatprep.subr.bf16.mxu0 %v565_v4  ;;  %vm166_vm3 = vcmask 326656   ;;  %vm341_vm4 = vcmask 523264  }
   0xa   :  { %460 = vmatmul.mubr.msk.bf16.vlgmr.msra.gmra.mrb[0].mxu0 %vm50_vm2, %v45_v10  ;;  %468 = vmatmul.mubr.msk.bf16.vlgmr.msra.gmra.mrb[0].mxu1 %vm50_vm2, %v47_v11  ;;  %v42_v15 = vld [vmem:[%s780_s2 + $0x10] sm:$0xff]  ;;  %v43_v16 = vld [vmem:[%s780_s2 + $0x18] sm:$0xff]  ;;  %v39_v17 = vld [vmem:[%s779_s1 + $0x20] sm:$0xff]  ;;  %vm399_vm5 = vcmask 531456   ;;  %s569_s29 = smov [#allocation3]  }
   0xb   :  { %463 = vmatprep.mubr.msk.bf16.mxu0 %vm566_vm1, %v565_v4  ;;  %477 = vmatprep.mubr.msk.bf16.mxu1 %vm566_vm1, %v565_v4  ;;  %v46_v18 = vpack.c.bf16 %v43_v16, %v42_v15  ;;  %v518_v45 = vld [vmem:[%s778_s0] sm:$0xff]   ;;  %v519_v46 = vld [vmem:[%s778_s0 + $0x8] sm:$0xff]   ;;  %v520_v47 = vld [vmem:[%s778_s0 + $0x10] ss:$0 sps:$4 sm:$0xff]   ;;  %s415_s30 = sshll.u32 %s569_s29, 4  ;;  %s416_s30 = int_to_ptr.vmem [resolvable:$true] %s415_s30 }
   0xc   :  { %127 = vperm.xlu0 %516, %v36_v13   ;;  %137 = vperm.xlu1 %517, %v38_v14   ;;  %v435_v49 = vld [vmem:[%s782_s4] ss:$0 sm:$0xff]  ;;  %s541_s8 = scalar_lea.vmem %s416_s30, 640  ;;  %p546_p1 = scmp.lt.s32.totalorder %s416_s30, %s416_s30 }
   0xd   :  { %p542_p0 = scmp.ne.s32.totalorder %s416_s30, %s541_s8  ;;  %p547_p2 = scmp.lt.s32.totalorder %s541_s8, %s541_s8 }
   0xf   :  { %p548_p3 = por %p547_p2, %p546_p1 }
  0x10   :  { %142 = vperm.xlu0 %516, %v39_v17  }
  0x11   :  { %p549_p4 = pnand %p548_p3, %p542_p0 }
  0x12   :  { %464 = vmatmul.mubr.msk.bf16.gmra.mrb[4].mxu0 %vm50_vm2, %v46_v18 }
  0x13   :  { %495 = vmatprep.mubr.msk.bf16.mxu0 %vm566_vm1, %v565_v4 }
  0x87   :  { %v666_v19 = vpop.permute.xlu0 %122  ;;  %v672_v31 = vpop.permute.xlu1 %132 }
  0x8b   :  { %v668_v20 = vpop.permute.xlu0 %127  ;;  %v678_v37 = vpop.permute.xlu1 %137 }
  0x8f   :  { %v674_v33 = vpop.permute.xlu0 %142 }
  0xdd   :  { %v98_v21 = vpop.f32.mrb[0].mxu0  ;;  %v114_v22 = vpop.f32.mrb[0].mxu1 }
  0xde   :  { %v461_v23 = vpop.f32.mrb[1].mxu0  ;;  %v469_v24 = vpop.f32.mrb[1].mxu1  ;;  %v145_v27 = vmul.f32 %v666_v19, %v98_v21  ;;  %v149_v36 = vmul.f32 %v674_v33, %v114_v22 }
  0xdf   :  { %v101_v25 = vpop.f32.mrb[2].mxu0  ;;  %v117_v26 = vpop.f32.mrb[2].mxu1 }
  0xe0   :  { %v146_v28 = vmul.f32 %v668_v20, %v101_v25  ;;  %v462_v29 = vpop.f32.mrb[3].mxu0  ;;  %v470_v30 = vpop.f32.mrb[3].mxu1  ;;  %v152_v43 = vpack.c.bf16 %v149_v36, %v149_v36  ;;  %v439_v25 = vld [vmem:[%s783_s5] ss:$0 sm:$0xff]  ;;  %s568_s5 = smov 64  }
  0xe2   :  { %v150_v32 = vpack.c.bf16 %v146_v28, %v145_v27  ;;  %v177_v44 = vsel %vm60_vm0, %v152_v43, 0 }
  0xe4   :  { %472 = vmatpush3.bf16.msra.mxu1 %v150_v32 }
  0xe5   :  { %v106_v34 = vpop.f32.mrb[4].mxu0  ;;  %473 = vmatprep.subr.bf16.mxu1 %v565_v4 }
  0xe6   :  { %v465_v35 = vpop.f32.mrb[5].mxu0  ;;  %v147_v39 = vmul.f32 %v672_v31, %v106_v34 }
  0xe7   :  { %v109_v38 = vpop.f32.mrb[6].mxu0 }
  0xe8   :  { %v148_v40 = vmul.f32 %v678_v37, %v109_v38  ;;  %v466_v41 = vpop.f32.mrb[7].mxu0 }
  0xea   :  { %v151_v42 = vpack.c.bf16 %v148_v40, %v147_v39 }
  0xec   :  { %474 = vmatpush3.bf16.msra.mxu1 %v151_v42 }
  0xed   :  { %475 = vmatprep.subr.bf16.mxu1 %v565_v4 }
  0xf0   :  { %476 = vmatpush3.bf16.msra.mxu1 %v177_v44 }
  0xf3   :  { %478 = vmatmul.mubr.msk.bf16.vlgmr.msra.gmra.mrb[4].mxu1 %vm166_vm3, %v518_v45 }
  0xf4   :  { %481 = vmatprep.mubr.msk.bf16.mxu1 %vm566_vm1, %v565_v4 }
  0xfb   :  { %482 = vmatmul.mubr.msk.bf16.gmra.mrb[8].mxu1 %vm166_vm3, %v519_v46 }
  0xfc   :  { %485 = vmatprep.mubr.msk.bf16.mxu1 %vm566_vm1, %v565_v4 }
 0x103   :  { %486 = vmatmul.mubr.msk.bf16.gmra.mrb[12].mxu1 %vm166_vm3, %v520_v47 }
 0x1c6   :  { %v213_v48 = vpop.f32.mrb[4].mxu1 }
 0x1c7   :  { %v235_v50 = vmul.f32 %v213_v48, %v666_v19  ;;  %v479_v51 = vpop.f32.mrb[5].mxu1 }
 0x1c8   :  { %v216_v52 = vpop.f32.mrb[6].mxu1 }
 0x1c9   :  { %v247_v53 = vadd.f32 %v435_v49, %v235_v50  ;;  %v236_v54 = vmul.f32 %v216_v52, %v668_v20  ;;  %v480_v55 = vpop.f32.mrb[7].mxu1 }
 0x1cb   :  { %521 = vtanh.f32 %v247_v53  ;;  %v248_v56 = vadd.f32 %v435_v49, %v236_v54 }
 0x1cd   :  { %523 = vtanh.f32 %v248_v56 }
 0x1ce   :  { %v221_v57 = vpop.f32.mrb[8].mxu1 }
 0x1cf   :  { %v237_v58 = vmul.f32 %v221_v57, %v672_v31  ;;  %v483_v59 = vpop.f32.mrb[9].mxu1 }
 0x1d0   :  { %v224_v60 = vpop.f32.mrb[10].mxu1 }
 0x1d1   :  { %v249_v61 = vadd.f32 %v435_v49, %v237_v58  ;;  %v238_v62 = vmul.f32 %v224_v60, %v678_v37  ;;  %v484_v63 = vpop.f32.mrb[11].mxu1 }
 0x1d3   :  { %525 = vtanh.f32 %v249_v61  ;;  %v250_v0 = vadd.f32 %v435_v49, %v238_v62 }
 0x1d5   :  { %v707_v1 = vpop.eup %521  ;;  %527 = vtanh.f32 %v250_v0 }
 0x1d6   :  { %v229_v2 = vpop.f32.mrb[12].mxu1  ;;  %v257_v8 = vmul.f32 %v707_v1, %v666_v19 }
 0x1d7   :  { %v709_v3 = vpop.eup %523  ;;  %v239_v5 = vmul.f32 %v229_v2, %v674_v33  ;;  %v487_v6 = vpop.f32.mrb[13].mxu1 }
 0x1d8   :  { %v232_v7 = vpop.f32.mrb[14].mxu1  ;;  %v258_v9 = vmul.f32 %v709_v3, %v668_v20 }
 0x1d9   :  { %v251_v10 = vadd.f32 %v435_v49, %v239_v5  ;;  %v488_v11 = vpop.f32.mrb[15].mxu1 }
 0x1da   :  { %v262_v12 = vpack.c.bf16 %v258_v9, %v257_v8 }
 0x1db   :  { %529 = vtanh.f32 %v251_v10 }
 0x1dc   :  { %490 = vmatpush3.bf16.msra.mxu0 %v262_v12 }
 0x1dd   :  { %v716_v13 = vpop.eup %525  ;;  %491 = vmatprep.subr.bf16.mxu0 %v565_v4 }
 0x1de   :  { %v259_v15 = vmul.f32 %v716_v13, %v672_v31 }
 0x1df   :  { %v719_v14 = vpop.eup %527 }
 0x1e0   :  { %v260_v16 = vmul.f32 %v719_v14, %v678_v37 }
 0x1e2   :  { %v263_v17 = vpack.c.bf16 %v260_v16, %v259_v15 }
 0x1e4   :  { %492 = vmatpush3.bf16.msra.mxu0 %v263_v17 }
 0x1e5   :  { %v725_v18 = vpop.eup %529  ;;  %493 = vmatprep.subr.bf16.mxu0 %v565_v4 }
 0x1e6   :  { %v261_v21 = vmul.f32 %v725_v18, %v674_v33 }
 0x1e8   :  { %v264_v22 = vpack.c.bf16 %v261_v21, %v261_v21 }
 0x1ea   :  { %v266_v23 = vsel %vm60_vm0, %v264_v22, 0 }
 0x1eb   :  { %494 = vmatpush3.bf16.msra.mxu0 %v266_v23 }
 0x1ee   :  { %496 = vmatmul.mubr.msk.bf16.vlgmr.msra.gmra.mrb[8].mxu0 %vm166_vm3, %v518_v45 }
 0x1ef   :  { %499 = vmatprep.mubr.msk.bf16.mxu0 %vm566_vm1, %v565_v4 }
 0x1f6   :  { %500 = vmatmul.mubr.msk.bf16.gmra.mrb[12].mxu0 %vm166_vm3, %v519_v46 }
 0x1f7   :  { %503 = vmatprep.mubr.msk.bf16.mxu0 %vm566_vm1, %v565_v4 }
 0x1fe   :  { %504 = vmatmul.mubr.msk.bf16.gmra.mrb[16].mxu0 %vm166_vm3, %v520_v47 }
 0x2c1   :  { %v302_v24 = vpop.f32.mrb[8].mxu0 }
 0x2c2   :  { %v324_v26 = vmul.f32 %v302_v24, %v666_v19  ;;  %v497_v27 = vpop.f32.mrb[9].mxu0 }
 0x2c3   :  { %v305_v28 = vpop.f32.mrb[10].mxu0 }
 0x2c4   :  { %v325_v29 = vmul.f32 %v305_v28, %v668_v20  ;;  %v498_v30 = vpop.f32.mrb[11].mxu0  ;;  %v336_v32 = vmul.f32 %v439_v25, %v324_v26 }
 0x2c6   :  { %v342_v34 = vsel %vm341_vm4, %v336_v32, 0.0  ;;  %v337_v35 = vmul.f32 %v439_v25, %v325_v29 }
 0x2c7   :  { %343 = vadd.xlane.f32.xlu1 %v342_v34 }
 0x2c8   :  { %v345_v4 = vsel %vm341_vm4, %v337_v35, 0.0 }
 0x2c9   :  { %346 = vadd.xlane.f32.xlu0 %v345_v4  ;;  %v310_v36 = vpop.f32.mrb[12].mxu0 }
 0x2ca   :  { %v326_v38 = vmul.f32 %v310_v36, %v672_v31  ;;  %v501_v39 = vpop.f32.mrb[13].mxu0 }
 0x2cb   :  { %v313_v40 = vpop.f32.mrb[14].mxu0 }
 0x2cc   :  { %v327_v19 = vmul.f32 %v313_v40, %v678_v37  ;;  %v502_v41 = vpop.f32.mrb[15].mxu0  ;;  %v338_v42 = vmul.f32 %v439_v25, %v326_v38  ;;  %v440_v37 = vld [vmem:[#allocation2] ss:$0 sm:$0xff] }
 0x2ce   :  { %v348_v20 = vsel %vm341_vm4, %v338_v42, 0.0  ;;  %v339_v43 = vmul.f32 %v439_v25, %v327_v19 }
 0x2cf   :  { %349 = vadd.xlane.f32.xlu0 %v348_v20 }
 0x2d0   :  { %v351_v44 = vsel %vm341_vm4, %v339_v43, 0.0 }
 0x2d1   :  { %352 = vadd.xlane.f32.xlu1 %v351_v44  ;;  %v318_v45 = vpop.f32.mrb[16].mxu0 }
 0x2d2   :  { %v328_v46 = vmul.f32 %v318_v45, %v674_v33  ;;  %v505_v47 = vpop.f32.mrb[17].mxu0 }
 0x2d3   :  { %v321_v48 = vpop.f32.mrb[18].mxu0 }
 0x2d4   :  { %v506_v49 = vpop.f32.mrb[19].mxu0  ;;  %v340_v31 = vmul.f32 %v439_v25, %v328_v46 }
 0x2d6   :  { %v354_v50 = vsel %vm341_vm4, %v340_v31, 0.0 }
 0x2d7   :  { %355 = vadd.xlane.f32.xlu0 %v354_v50 }
 0x354   :  { %v344_v51 = vpop.xlane.xlu1 %343 }
 0x355   :  { %v364_v52 = vadd.f32 %v440_v37, %v344_v51 }
 0x356   :  { %v347_v53 = vpop.xlane.xlu0 %346 }
 0x357   :  { %531 = vtanh.f32 %v364_v52  ;;  %v365_v54 = vadd.f32 %v440_v37, %v347_v53 }
 0x359   :  { %533 = vtanh.f32 %v365_v54 }
 0x35c   :  { %v350_v55 = vpop.xlane.xlu0 %349 }
 0x35d   :  { %v366_v56 = vadd.f32 %v440_v37, %v350_v55 }
 0x35e   :  { %v353_v57 = vpop.xlane.xlu1 %352 }
 0x35f   :  { %535 = vtanh.f32 %v366_v56  ;;  %v367_v58 = vadd.f32 %v440_v37, %v353_v57 }
 0x361   :  { %v532_v33 = vpop.eup %531  ;;  %537 = vtanh.f32 %v367_v58 }
 0x362   :  { %379 = vrot.lane.b32.xlu1 %v532_v33, %s568_s5 }
 0x363   :  { %v534_v59 = vpop.eup %533 }
 0x364   :  { %381 = vrot.lane.b32.xlu0 %v534_v59, %s568_s5  ;;  %v356_v60 = vpop.xlane.xlu0 %355 }
 0x365   :  { %v368_v61 = vadd.f32 %v440_v37, %v356_v60 }
 0x367   :  { %539 = vtanh.f32 %v368_v61 }
 0x369   :  { %v536_v62 = vpop.eup %535 }
 0x36a   :  { %383 = vrot.lane.b32.xlu1 %v536_v62, %s568_s5 }
 0x36b   :  { %v538_v63 = vpop.eup %537 }
 0x36e   :  { %385 = vrot.lane.b32.xlu1 %v538_v63, %s568_s5 }
 0x371   :  { %v540_v0 = vpop.eup %539 }
 0x372   :  { %387 = vrot.lane.b32.xlu0 %v540_v0, %s568_s5 }
 0x3d4   :  { %v380_v2 = vpop.permute.xlu1 %379 }
 0x3d5   :  { %v394_v5 = vsel %vm341_vm4, %v707_v1, %v380_v2 }
 0x3d6   :  { %v400_v6 = vsel %vm399_vm5, %v394_v5, 0.0  ;;  %v382_v7 = vpop.permute.xlu0 %381 }
 0x3d7   :  { %405 = vst [vmem:[#allocation3] sm:$0xff] %v400_v6  ;;  %v395_v8 = vsel %vm341_vm4, %v709_v3, %v382_v7 }
 0x3d8   :  { %v401_v9 = vsel %vm399_vm5, %v395_v8, 0.0 }
 0x3d9   :  { %406 = vst [vmem:[#allocation3 + $0x8] sm:$0xff] %v401_v9 }
 0x3dc   :  { %v384_v10 = vpop.permute.xlu1 %383 }
 0x3dd   :  { %v396_v11 = vsel %vm341_vm4, %v716_v13, %v384_v10 }
 0x3de   :  { %v402_v12 = vsel %vm399_vm5, %v396_v11, 0.0 }
 0x3df   :  { %407 = vst [vmem:[#allocation3 + $0x10] sm:$0xff] %v402_v12 }
 0x3e0   :  { %v386_v15 = vpop.permute.xlu1 %385 }
 0x3e1   :  { %v397_v1 = vsel %vm341_vm4, %v719_v14, %v386_v15 }
 0x3e2   :  { %v403_v16 = vsel %vm399_vm5, %v397_v1, 0.0 }
 0x3e3   :  { %408 = vst [vmem:[#allocation3 + $0x18] sm:$0xff] %v403_v16 }
 0x3e4   :  { %v388_v3 = vpop.permute.xlu0 %387 }
 0x3e5   :  { %v398_v17 = vsel %vm341_vm4, %v725_v18, %v388_v3 }
 0x3e6   :  { %v404_v21 = vsel %vm399_vm5, %v398_v17, 0.0 }
 0x3e7   :  { %409 = vst [vmem:[#allocation3 + $0x20] sm:$0xff] %v404_v21 }
 0x3e8   :  { %552 = shalt.err (!%p549_p4)
}
 0x3e9   :  { %s553_s3 = scalar_lea.hbm %s785_s7, 640 }
 0x3ea   :  { %p554_p5 = scmp.ne.s32.totalorder %s785_s7, %s553_s3  ;;  %p557_p6 = scmp.lt.u32.totalorder %s553_s3, %s785_s7 }
 0x3ec   :  { %p559_p7 = pnand %p557_p6, %p554_p5 }
 0x3ee   :  { %562 = shalt.err (!%p559_p7)
}
 0x3ef   :  { %s570_s14 = smov 128   ;;  %s571_s15 = smov 8  }
 0x3f0   :  { %421 = dma.vmem_to_hbm [thread:$0]  %s416_s30, 640, %s785_s7, [#allocation4], %s570_s14, %s570_s14, %s571_s15  }
 0x3f1   :  { %563 = dma.done.wait [#allocation4], 640  }
 0x3f2   :  { %564 = vsyncadd [#allocation4], 4294966656 }
 0x3f3   :  { %425 = vsyncpa [#allocation4], 1 }

</bundles_post_ra>
